<compile_context>
chip_gen: v7x
topology: tpu7x:2x2x1
jax: 0.10.0
libtpu: 0.0.40
codegen_flags: <defaults>
</compile_context>

<pallas_src>
import functools

import jax
import jax.numpy as jnp
from jax.experimental import pallas as pl
from jax.experimental.pallas import tpu as pltpu


def _block_kernel(x_ref, w1_ref, w2_ref, mask_ref, out_ref, col_ref,
                  *, H, W, Cin, C1, C2, ib, k, leak):
    HW = H * W
    p = (k - 1) // 2
    ib_c1 = ib * C1
    ib_cin = ib * Cin
    k_taps = k * k * ib_c1          # rows of col occupied by the im2col taps

    x = x_ref[0]                                         # (ib*Cin, HW) lane-dense

    # Tail rows of the im2col matrix: [x ; 1].  They carry the residual add and
    # the BN2 bias through the conv2 matmul, and (with the BN1 bias as the last
    # w1 column) double as the conv1 RHS.
    x_aug = jnp.concatenate([x, jnp.ones((1, HW), jnp.float32)], axis=0)
    col_ref[pl.ds(k_taps, ib_cin + 1), :] = x_aug

    # ---- conv1 (1x1), BN1 scale+bias folded into w1; LeakyReLU --------------
    h1 = jnp.dot(w1_ref[...], x_aug, preferred_element_type=jnp.float32)
    h1 = jnp.where(h1 > 0, h1, leak * h1)                # (ib*C1, HW)

    # ---- im2col taps: lane roll (XLU) * precomputed boundary mask -----------
    # roll is along the lane (HW) axis only, so folded images (different
    # sublane rows) never mix; the masks zero every wrapped position.
    masks = mask_ref[...]                                # (k*k, HW) 0/1 f32
    for dy in range(k):
        for dx in range(k):
            t = dy * k + dx
            oy, ox = dy - p, dx - p
            s = oy * W + ox                              # flat lane offset of tap
            tap = h1 if s == 0 else pltpu.roll(h1, shift=(-s) % HW, axis=1)
            if oy != 0 or ox != 0:                       # center tap: mask == 1
                tap = tap * masks[t:t + 1, :]
            col_ref[pl.ds(t * ib_c1, ib_c1), :] = tap

    # ---- conv2 + BN2 (scale & bias) + residual as ONE matmul; LeakyReLU -----
    out = jnp.dot(w2_ref[...], col_ref[...], preferred_element_type=jnp.float32)
    out = jnp.where(out > 0, out, leak * out)
    out_ref[0] = out.astype(out_ref.dtype)


def _default_images_per_step(batch):
    """Whole batch in one grid step on single-TC chips; 2-way grid on v7x."""
    try:
        kind = jax.devices()[0].device_kind.lower()
    except Exception:
        kind = ""
    if batch % 2 == 0 and ("v7" in kind or "7x" in kind):
        return batch // 2        # one image per TensorCore per step
    return batch                 # v5e / v6e: single grid step


def sparse_residual_block(x_nchw, w1, s1, b1, w2_taps, s2, b2, *, kernel, leak,
                          images_per_step=None):
    """x_nchw: (B, Cin, H, W) float32.  Returns (B, C2, H, W)."""
    B, Cin, H, W = x_nchw.shape
    C1 = w1.shape[1]
    C2 = w2_taps.shape[-1]
    assert C2 == Cin, "residual add requires outfilters2 == infilters"
    k = kernel
    kk = k * k
    HW = H * W

    ib = images_per_step if images_per_step is not None else _default_images_per_step(B)
    assert B % ib == 0
    G = B // ib
    eye_ib = jnp.eye(ib, dtype=jnp.float32)

    # conv1 weight: BN1 scale folded, block-diagonal over the ib folded images,
    # BN1 bias appended as an extra K column -> (ib*C1, ib*Cin + 1).
    w1s = (w1 * s1).T.astype(jnp.float32)                        # (C1, Cin)
    w1_bd = jnp.einsum('ab,ck->acbk', eye_ib, w1s).reshape(ib * C1, ib * Cin)
    b1_col = jnp.tile(b1.reshape(C1, 1).astype(jnp.float32), (ib, 1))
    w1f = jnp.concatenate([w1_bd, b1_col], axis=1)

    # conv2 weight: BN2 scale folded, block-diagonal, plus residual-identity and
    # BN2-bias columns -> (ib*C2, k*k*ib*C1 + ib*Cin + 1).
    w2s = (jnp.transpose(w2_taps, (2, 0, 1)).astype(jnp.float32)
           * s2.reshape(C2, 1, 1))                               # (C2, kk, C1)
    w2_bd = jnp.einsum('ab,ctk->actbk', eye_ib, w2s).reshape(ib * C2, kk * ib * C1)
    res_eye = jnp.eye(ib * C2, dtype=jnp.float32)                # residual (C2==Cin)
    b2_col = jnp.tile(b2.reshape(C2, 1).astype(jnp.float32), (ib, 1))
    w2f = jnp.concatenate([w2_bd, res_eye, b2_col], axis=1)
    K2 = kk * ib * C1 + ib * Cin + 1

    # Per-tap zero-padding boundary masks, computed once outside the kernel.
    p = (k - 1) // 2
    lane = jnp.arange(HW, dtype=jnp.int32)
    hh, ww = lane // W, lane % W
    mrows = []
    for dy in range(k):
        for dx in range(k):
            oy, ox = dy - p, dx - p
            mrows.append((hh + oy >= 0) & (hh + oy < H)
                         & (ww + ox >= 0) & (ww + ox < W))
    masks = jnp.stack(mrows).astype(jnp.float32)                 # (kk, HW)

    # NCHW -> (G, ib*Cin, HW): pure reshape, images fold into the sublane axis.
    x_flat = x_nchw.reshape(G, ib * Cin, HW)

    kern = functools.partial(_block_kernel, H=H, W=W, Cin=Cin, C1=C1, C2=C2,
                             ib=ib, k=k, leak=leak)

    out_flat = pl.pallas_call(
        kern,
        grid=(G,),
        in_specs=[
            pl.BlockSpec((1, ib * Cin, HW), lambda g: (g, 0, 0)),
            pl.BlockSpec((ib * C1, ib * Cin + 1), lambda g: (0, 0)),
            pl.BlockSpec((ib * C2, K2), lambda g: (0, 0)),
            pl.BlockSpec((kk, HW), lambda g: (0, 0)),
        ],
        out_specs=pl.BlockSpec((1, ib * C2, HW), lambda g: (g, 0, 0)),
        out_shape=jax.ShapeDtypeStruct((G, ib * C2, HW), x_nchw.dtype),
        scratch_shapes=[pltpu.VMEM((K2, HW), jnp.float32)],
        compiler_params=pltpu.CompilerParams(
            dimension_semantics=("parallel",)),
    )(x_flat, w1f, w2f, masks)

    return out_flat.reshape(B, C2, H, W)


def _reference(x_nchw, w1, s1, b1, w2_taps, s2, b2, *, kernel, leak):
    """Pure-JAX reference (same math, no Pallas)."""
    B, Cin, H, W = x_nchw.shape
    k = kernel
    p = (k - 1) // 2
    x = jnp.transpose(x_nchw, (0, 2, 3, 1))
    h1 = jnp.einsum('bhwc,cd->bhwd', x, w1)
    h1 = h1 * s1 + b1
    h1 = jnp.where(h1 > 0, h1, leak * h1)
    h1p = jnp.pad(h1, ((0, 0), (p, p), (p, p), (0, 0)))
    acc = jnp.zeros((B, H, W, w2_taps.shape[-1]), jnp.float32)
    for dy in range(k):
        for dx in range(k):
            acc = acc + jnp.einsum('bhwc,cd->bhwd',
                                   h1p[:, dy:dy + H, dx:dx + W, :],
                                   w2_taps[dy * k + dx])
    acc = acc * s2 + b2
    out = acc + x
    out = jnp.where(out > 0, out, leak * out)
    return jnp.transpose(out, (0, 3, 1, 2))


if __name__ == "__main__":
    # Module config: infilters=4, outfilters1=8, outfilters2=4, kernel=3,
    # batch_norm=True, activation='leaky', nplanes=1.
    B, Cin, H, W = 2, 4, 16, 16
    C1, C2, KERNEL = 8, 4, 3
    LEAK = 0.333          # scn LeakyReLU / BatchNormLeakyReLU default leakiness
    EPS = 1e-4            # scn BatchNormalization default eps

    key = jax.random.PRNGKey(0)
    keys = jax.random.split(key, 12)

    x = jax.random.normal(keys[0], (B, Cin, H, W), jnp.float32)

    # conv1 weight: filter [1,1,1] -> (Cin, C1); conv2 weight: filter [1,k,k]
    # -> (k*k taps, C1, C2). Deterministic synthetic init (no checkpoint).
    w1 = jax.random.normal(keys[1], (Cin, C1), jnp.float32) * 0.3
    w2 = jax.random.normal(keys[2], (KERNEL * KERNEL, C1, C2), jnp.float32) * 0.2

    # BN1 (BatchNormLeakyReLU) params, folded to inference scale/bias.
    g1 = 1.0 + 0.1 * jax.random.normal(keys[3], (1, C1), jnp.float32)
    be1 = 0.1 * jax.random.normal(keys[4], (1, C1), jnp.float32)
    m1 = 0.1 * jax.random.normal(keys[5], (1, C1), jnp.float32)
    v1 = 1.0 + 0.1 * jax.nn.softplus(jax.random.normal(keys[6], (1, C1), jnp.float32))
    s1 = g1 / jnp.sqrt(v1 + EPS)
    b1 = be1 - m1 * s1

    # BN2 (BatchNormalization) params.
    g2 = 1.0 + 0.1 * jax.random.normal(keys[7], (1, C2), jnp.float32)
    be2 = 0.1 * jax.random.normal(keys[8], (1, C2), jnp.float32)
    m2 = 0.1 * jax.random.normal(keys[9], (1, C2), jnp.float32)
    v2 = 1.0 + 0.1 * jax.nn.softplus(jax.random.normal(keys[10], (1, C2), jnp.float32))
    s2 = g2 / jnp.sqrt(v2 + EPS)
    b2 = be2 - m2 * s2

    out = sparse_residual_block(x, w1, s1, b1, w2, s2, b2,
                                kernel=KERNEL, leak=LEAK)
    out = jax.block_until_ready(out)

    ref = _reference(x, w1, s1, b1, w2, s2, b2, kernel=KERNEL, leak=LEAK)
    assert out.shape == (B, C2, H, W)
    assert jnp.allclose(out, ref, atol=1e-3, rtol=1e-3), "mismatch vs reference"

    print("KERNEL_OK")
</pallas_src>

<mosaic_0001>
module attributes {stable_mosaic.version = 11 : i64} {
  func.func @_block_kernel(%arg0: i32, %arg1: memref<1x8x256xf32, #tpu.memory_space<vmem>>, %arg2: memref<16x9xf32, #tpu.memory_space<vmem>>, %arg3: memref<8x153xf32, #tpu.memory_space<vmem>>, %arg4: memref<9x256xf32, #tpu.memory_space<vmem>>, %arg5: memref<1x8x256xf32, #tpu.memory_space<vmem>>, %arg6: memref<153x256xf32, #tpu.memory_space<vmem>>) attributes {dimension_semantics = [#tpu.dimension_semantics<parallel>], iteration_bounds = array<i64: 1>, scalar_prefetch = 0 : i64, scratch_operands = 1 : i64, tpu.core_type = #tpu.core_type<tc>, window_params = [{transform_indices = @transform_0, window_bounds = array<i64: 1, 8, 256>}, {pipeline_mode = #tpu.pipeline_mode<synchronous>, transform_indices = @transform_1, window_bounds = array<i64: 16, 9>}, {pipeline_mode = #tpu.pipeline_mode<synchronous>, transform_indices = @transform_2, window_bounds = array<i64: 8, 153>}, {pipeline_mode = #tpu.pipeline_mode<synchronous>, transform_indices = @transform_3, window_bounds = array<i64: 9, 256>}, {transform_indices = @transform_4, window_bounds = array<i64: 1, 8, 256>}]} {
    %c0 = arith.constant 0 : index
    %c0_0 = arith.constant 0 : index
    %c0_1 = arith.constant 0 : index
    %0 = vector.load %arg1[%c0, %c0_0, %c0_1] : memref<1x8x256xf32, #tpu.memory_space<vmem>>, vector<1x8x256xf32>
    %1 = vector.shape_cast %0 : vector<1x8x256xf32> to vector<8x256xf32>
    %cst = arith.constant 1.000000e+00 : f32
    %2 = vector.broadcast %cst : f32 to vector<1x256xf32>
    %3 = tpu.concatenate %1, %2 in 0 : vector<8x256xf32>, vector<1x256xf32> -> vector<9x256xf32>
    %c144 = arith.constant 144 : index
    %c0_2 = arith.constant 0 : index
    %4 = vector.load %arg6[%c144, %c0_2] : memref<153x256xf32, #tpu.memory_space<vmem>>, vector<9x256xf32>
    tpu.vector_store %arg6[%c144, %c0_2], %3 {strides = array<i32>} : memref<153x256xf32, #tpu.memory_space<vmem>>, vector<9x256xf32>,
    %c0_3 = arith.constant 0 : index
    %c0_4 = arith.constant 0 : index
    %5 = vector.load %arg2[%c0_3, %c0_4] : memref<16x9xf32, #tpu.memory_space<vmem>>, vector<16x9xf32>
    %cst_5 = arith.constant dense<0.000000e+00> : vector<16x256xf32>
    %6 = tpu.matmul %5, %3, %cst_5 {dimension_numbers = #tpu.dot_dimension_numbers<[1], [0], [0], [1], [0, 0, 1, 1], [], []>} : vector<16x9xf32>, vector<9x256xf32>, vector<16x256xf32> -> vector<16x256xf32>
    %cst_6 = arith.constant 0.000000e+00 : f32
    %7 = vector.broadcast %cst_6 : f32 to vector<16x256xf32>
    %8 = arith.cmpf ogt, %6, %7 : vector<16x256xf32>
    %cst_7 = arith.constant 3.330000e-01 : f32
    %9 = vector.broadcast %cst_7 : f32 to vector<16x256xf32>
    %10 = arith.mulf %9, %6 : vector<16x256xf32>
    %11 = arith.select %8, %6, %10 : vector<16x256xi1>, vector<16x256xf32>
    %c0_8 = arith.constant 0 : index
    %c0_9 = arith.constant 0 : index
    %12 = vector.load %arg4[%c0_8, %c0_9] : memref<9x256xf32, #tpu.memory_space<vmem>>, vector<9x256xf32>
    %c17_i32 = arith.constant 17 : i32
    %13 = tpu.dynamic_rotate %11 by %c17_i32 dim 1 : vector<16x256xf32>, i32 -> vector<16x256xf32>
    %14 = vector.extract_strided_slice %12 {offsets = [0, 0], sizes = [1, 256], strides = [1, 1]} : vector<9x256xf32> to vector<1x256xf32>
    %15 = vector.broadcast %14 : vector<1x256xf32> to vector<16x256xf32>
    %16 = arith.mulf %13, %15 : vector<16x256xf32>
    %c0_10 = arith.constant 0 : index
    %c0_11 = arith.constant 0 : index
    %17 = vector.load %arg6[%c0_10, %c0_11] : memref<153x256xf32, #tpu.memory_space<vmem>>, vector<16x256xf32>
    tpu.vector_store %arg6[%c0_10, %c0_11], %16 {strides = array<i32>} : memref<153x256xf32, #tpu.memory_space<vmem>>, vector<16x256xf32>,
    %c16_i32 = arith.constant 16 : i32
    %18 = tpu.dynamic_rotate %11 by %c16_i32 dim 1 : vector<16x256xf32>, i32 -> vector<16x256xf32>
    %19 = vector.extract_strided_slice %12 {offsets = [1, 0], sizes = [1, 256], strides = [1, 1]} : vector<9x256xf32> to vector<1x256xf32>
    %20 = vector.broadcast %19 : vector<1x256xf32> to vector<16x256xf32>
    %21 = arith.mulf %18, %20 : vector<16x256xf32>
    %c16 = arith.constant 16 : index
    %c0_12 = arith.constant 0 : index
    %22 = vector.load %arg6[%c16, %c0_12] : memref<153x256xf32, #tpu.memory_space<vmem>>, vector<16x256xf32>
    tpu.vector_store %arg6[%c16, %c0_12], %21 {strides = array<i32>} : memref<153x256xf32, #tpu.memory_space<vmem>>, vector<16x256xf32>,
    %c15_i32 = arith.constant 15 : i32
    %23 = tpu.dynamic_rotate %11 by %c15_i32 dim 1 : vector<16x256xf32>, i32 -> vector<16x256xf32>
    %24 = vector.extract_strided_slice %12 {offsets = [2, 0], sizes = [1, 256], strides = [1, 1]} : vector<9x256xf32> to vector<1x256xf32>
    %25 = vector.broadcast %24 : vector<1x256xf32> to vector<16x256xf32>
    %26 = arith.mulf %23, %25 : vector<16x256xf32>
    %c32 = arith.constant 32 : index
    %c0_13 = arith.constant 0 : index
    %27 = vector.load %arg6[%c32, %c0_13] : memref<153x256xf32, #tpu.memory_space<vmem>>, vector<16x256xf32>
    tpu.vector_store %arg6[%c32, %c0_13], %26 {strides = array<i32>} : memref<153x256xf32, #tpu.memory_space<vmem>>, vector<16x256xf32>,
    %c1_i32 = arith.constant 1 : i32
    %28 = tpu.dynamic_rotate %11 by %c1_i32 dim 1 : vector<16x256xf32>, i32 -> vector<16x256xf32>
    %29 = vector.extract_strided_slice %12 {offsets = [3, 0], sizes = [1, 256], strides = [1, 1]} : vector<9x256xf32> to vector<1x256xf32>
    %30 = vector.broadcast %29 : vector<1x256xf32> to vector<16x256xf32>
    %31 = arith.mulf %28, %30 : vector<16x256xf32>
    %c48 = arith.constant 48 : index
    %c0_14 = arith.constant 0 : index
    %32 = vector.load %arg6[%c48, %c0_14] : memref<153x256xf32, #tpu.memory_space<vmem>>, vector<16x256xf32>
    tpu.vector_store %arg6[%c48, %c0_14], %31 {strides = array<i32>} : memref<153x256xf32, #tpu.memory_space<vmem>>, vector<16x256xf32>,
    %c64 = arith.constant 64 : index
    %c0_15 = arith.constant 0 : index
    %33 = vector.load %arg6[%c64, %c0_15] : memref<153x256xf32, #tpu.memory_space<vmem>>, vector<16x256xf32>
    tpu.vector_store %arg6[%c64, %c0_15], %11 {strides = array<i32>} : memref<153x256xf32, #tpu.memory_space<vmem>>, vector<16x256xf32>,
    %c255_i32 = arith.constant 255 : i32
    %34 = tpu.dynamic_rotate %11 by %c255_i32 dim 1 : vector<16x256xf32>, i32 -> vector<16x256xf32>
    %35 = vector.extract_strided_slice %12 {offsets = [5, 0], sizes = [1, 256], strides = [1, 1]} : vector<9x256xf32> to vector<1x256xf32>
    %36 = vector.broadcast %35 : vector<1x256xf32> to vector<16x256xf32>
    %37 = arith.mulf %34, %36 : vector<16x256xf32>
    %c80 = arith.constant 80 : index
    %c0_16 = arith.constant 0 : index
    %38 = vector.load %arg6[%c80, %c0_16] : memref<153x256xf32, #tpu.memory_space<vmem>>, vector<16x256xf32>
    tpu.vector_store %arg6[%c80, %c0_16], %37 {strides = array<i32>} : memref<153x256xf32, #tpu.memory_space<vmem>>, vector<16x256xf32>,
    %c241_i32 = arith.constant 241 : i32
    %39 = tpu.dynamic_rotate %11 by %c241_i32 dim 1 : vector<16x256xf32>, i32 -> vector<16x256xf32>
    %40 = vector.extract_strided_slice %12 {offsets = [6, 0], sizes = [1, 256], strides = [1, 1]} : vector<9x256xf32> to vector<1x256xf32>
    %41 = vector.broadcast %40 : vector<1x256xf32> to vector<16x256xf32>
    %42 = arith.mulf %39, %41 : vector<16x256xf32>
    %c96 = arith.constant 96 : index
    %c0_17 = arith.constant 0 : index
    %43 = vector.load %arg6[%c96, %c0_17] : memref<153x256xf32, #tpu.memory_space<vmem>>, vector<16x256xf32>
    tpu.vector_store %arg6[%c96, %c0_17], %42 {strides = array<i32>} : memref<153x256xf32, #tpu.memory_space<vmem>>, vector<16x256xf32>,
    %c240_i32 = arith.constant 240 : i32
    %44 = tpu.dynamic_rotate %11 by %c240_i32 dim 1 : vector<16x256xf32>, i32 -> vector<16x256xf32>
    %45 = vector.extract_strided_slice %12 {offsets = [7, 0], sizes = [1, 256], strides = [1, 1]} : vector<9x256xf32> to vector<1x256xf32>
    %46 = vector.broadcast %45 : vector<1x256xf32> to vector<16x256xf32>
    %47 = arith.mulf %44, %46 : vector<16x256xf32>
    %c112 = arith.constant 112 : index
    %c0_18 = arith.constant 0 : index
    %48 = vector.load %arg6[%c112, %c0_18] : memref<153x256xf32, #tpu.memory_space<vmem>>, vector<16x256xf32>
    tpu.vector_store %arg6[%c112, %c0_18], %47 {strides = array<i32>} : memref<153x256xf32, #tpu.memory_space<vmem>>, vector<16x256xf32>,
    %c239_i32 = arith.constant 239 : i32
    %49 = tpu.dynamic_rotate %11 by %c239_i32 dim 1 : vector<16x256xf32>, i32 -> vector<16x256xf32>
    %50 = vector.extract_strided_slice %12 {offsets = [8, 0], sizes = [1, 256], strides = [1, 1]} : vector<9x256xf32> to vector<1x256xf32>
    %51 = vector.broadcast %50 : vector<1x256xf32> to vector<16x256xf32>
    %52 = arith.mulf %49, %51 : vector<16x256xf32>
    %c128 = arith.constant 128 : index
    %c0_19 = arith.constant 0 : index
    %53 = vector.load %arg6[%c128, %c0_19] : memref<153x256xf32, #tpu.memory_space<vmem>>, vector<16x256xf32>
    tpu.vector_store %arg6[%c128, %c0_19], %52 {strides = array<i32>} : memref<153x256xf32, #tpu.memory_space<vmem>>, vector<16x256xf32>,
    %c0_20 = arith.constant 0 : index
    %c0_21 = arith.constant 0 : index
    %54 = vector.load %arg3[%c0_20, %c0_21] : memref<8x153xf32, #tpu.memory_space<vmem>>, vector<8x153xf32>
    %c0_22 = arith.constant 0 : index
    %c0_23 = arith.constant 0 : index
    %55 = vector.load %arg6[%c0_22, %c0_23] : memref<153x256xf32, #tpu.memory_space<vmem>>, vector<153x256xf32>
    %cst_24 = arith.constant dense<0.000000e+00> : vector<8x256xf32>
    %56 = tpu.matmul %54, %55, %cst_24 {dimension_numbers = #tpu.dot_dimension_numbers<[1], [0], [0], [1], [0, 0, 1, 1], [], []>} : vector<8x153xf32>, vector<153x256xf32>, vector<8x256xf32> -> vector<8x256xf32>
    %cst_25 = arith.constant 0.000000e+00 : f32
    %57 = vector.broadcast %cst_25 : f32 to vector<8x256xf32>
    %58 = arith.cmpf ogt, %56, %57 : vector<8x256xf32>
    %cst_26 = arith.constant 3.330000e-01 : f32
    %59 = vector.broadcast %cst_26 : f32 to vector<8x256xf32>
    %60 = arith.mulf %59, %56 : vector<8x256xf32>
    %61 = arith.select %58, %56, %60 : vector<8x256xi1>, vector<8x256xf32>
    %c0_27 = arith.constant 0 : index
    %c0_28 = arith.constant 0 : index
    %c0_29 = arith.constant 0 : index
    %62 = vector.load %arg5[%c0_27, %c0_28, %c0_29] : memref<1x8x256xf32, #tpu.memory_space<vmem>>, vector<1x8x256xf32>
    %63 = vector.shape_cast %62 : vector<1x8x256xf32> to vector<8x256xf32>
    %64 = vector.shape_cast %61 : vector<8x256xf32> to vector<1x8x256xf32>
    tpu.vector_store %arg5[%c0_27, %c0_28, %c0_29], %64 {strides = array<i32>} : memref<1x8x256xf32, #tpu.memory_space<vmem>>, vector<1x8x256xf32>,
    return
  }
  func.func @transform_0(%arg0: i32) -> (i32, i32, i32) {
    %c0_i32 = arith.constant 0 : i32
    %c0_i32_0 = arith.constant 0 : i32
    %c0_i32_1 = arith.constant 0 : i32
    return %arg0, %c0_i32, %c0_i32_0 : i32, i32, i32
  }
  func.func @transform_1(%arg0: i32) -> (i32, i32) {
    %c0_i32 = arith.constant 0 : i32
    %c0_i32_0 = arith.constant 0 : i32
    %c0_i32_1 = arith.constant 0 : i32
    return %c0_i32, %c0_i32_0 : i32, i32
  }
  func.func @transform_2(%arg0: i32) -> (i32, i32) {
    %c0_i32 = arith.constant 0 : i32
    %c0_i32_0 = arith.constant 0 : i32
    %c0_i32_1 = arith.constant 0 : i32
    return %c0_i32, %c0_i32_0 : i32, i32
  }
  func.func @transform_3(%arg0: i32) -> (i32, i32) {
    %c0_i32 = arith.constant 0 : i32
    %c0_i32_0 = arith.constant 0 : i32
    %c0_i32_1 = arith.constant 0 : i32
    return %c0_i32, %c0_i32_0 : i32, i32
  }
  func.func @transform_4(%arg0: i32) -> (i32, i32, i32) {
    %c0_i32 = arith.constant 0 : i32
    %c0_i32_0 = arith.constant 0 : i32
    %c0_i32_1 = arith.constant 0 : i32
    return %arg0, %c0_i32, %c0_i32_0 : i32, i32, i32
  }
}

</mosaic_0001>

<bundles_post_ra>
// kernel: tpu_custom_call.1
= control target key start
LH: loop header
LB: loop body
LE: loop exit
PB: predicated region body
PF: predicated region fallthrough
CT: control target
= control target key end

     0   :  { %9 = vsyncpa [#allocation4], 0  ;;  %s1065_s0 = inlined_call_operand.hbm [shape: f32[1,8,256], index: 0, kind: input, shape index: {}]   ;;  %s1066_s1 = inlined_call_operand.hbm [shape: f32[16,9], index: 1, kind: input, shape index: {}]   ;;  %s1067_s2 = inlined_call_operand.hbm [shape: f32[8,153], index: 2, kind: input, shape index: {}]   ;;  %s1068_s3 = inlined_call_operand.hbm [shape: f32[9,256], index: 3, kind: input, shape index: {}]   ;;  %s1069_s4 = inlined_call_operand.hbm [shape: f32[1,8,256], index: 4, kind: output, shape index: {}]  }
   0x1   :  { %10 = vsyncpa [#allocation7], 0 }
   0x2   :  { %11 = vsyncpa [#allocation10], 0 }
   0x3   :  { %12 = vsyncpa [#allocation5], 0  ;;  %s761_s15 = smov [#allocation6]   ;;  %s643_s19 = scalar_lea.hbm %s1066_s1, 256 }
   0x4   :  { %s28_s16 = sshll.u32 %s761_s15, 4  ;;  %p644_p0 = scmp.ne.s32.totalorder %s1066_s1, %s643_s19  ;;  %s29_s16 = int_to_ptr.vmem [resolvable:$true] %s28_s16 }
   0x5   :  { %p647_p1 = scmp.lt.u32.totalorder %s643_s19, %s1066_s1 }
   0x7   :  { %p649_p2 = pnand %p647_p1, %p644_p0 }
   0x9   :  { %652 = shalt.err (!%p649_p2)
}
   0xa   :  { %s653_s24 = scalar_lea.vmem %s29_s16, 256  ;;  %p658_p4 = scmp.lt.s32.totalorder %s29_s16, %s29_s16 }
   0xb   :  { %p654_p3 = scmp.ne.s32.totalorder %s29_s16, %s653_s24  ;;  %p659_p5 = scmp.lt.s32.totalorder %s653_s24, %s653_s24 }
   0xd   :  { %p660_p6 = por %p659_p5, %p658_p4 }
   0xf   :  { %p661_p7 = pnand %p660_p6, %p654_p3 }
  0x11   :  { %664 = shalt.err (!%p661_p7)
}
  0x12   :  { %s762_s25 = smov 128   ;;  %s763_s26 = smov 8  }
  0x13   :  { %34 = dma.hbm_to_vmem [thread:$0]  %s1066_s1, 256, %s29_s16, [#allocation7], %s762_s25, %s762_s25, %s763_s26  }
  0x14   :  { %s764_s29 = smov [#allocation3]   ;;  %s765_s5 = smov [#allocation8]  }
  0x15   :  { %s19_s30 = sshll.u32 %s764_s29, 4  ;;  %s41_s6 = sshll.u32 %s765_s5, 4  ;;  %s20_s30 = int_to_ptr.vmem [resolvable:$true] %s19_s30  ;;  %s42_s6 = int_to_ptr.vmem [resolvable:$true] %s41_s6 }
  0x16   :  { %s665_s9 = scalar_lea.hbm %s1065_s0, 256 }
  0x17   :  { %p666_p8 = scmp.ne.s32.totalorder %s1065_s0, %s665_s9  ;;  %p669_p9 = scmp.lt.u32.totalorder %s665_s9, %s1065_s0 }
  0x19   :  { %p671_p10 = pnand %p669_p9, %p666_p8 }
  0x1b   :  { %674 = shalt.err (!%p671_p10)
}
  0x1c   :  { %s675_s1 = scalar_lea.vmem %s20_s30, 256  ;;  %p680_p12 = scmp.lt.s32.totalorder %s20_s30, %s20_s30 }
  0x1d   :  { %p676_p11 = scmp.ne.s32.totalorder %s20_s30, %s675_s1  ;;  %p681_p13 = scmp.lt.s32.totalorder %s675_s1, %s675_s1 }
  0x1f   :  { %p682_p0 = por %p681_p13, %p680_p12 }
  0x21   :  { %p683_p1 = pnand %p682_p0, %p676_p11 }
  0x23   :  { %686 = shalt.err (!%p683_p1)
}
  0x24   :  { %22 = dma.hbm_to_vmem [thread:$0]  %s1065_s0, 256, %s20_s30, [#allocation4]  }
  0x25   :  { %s687_s18 = scalar_lea.hbm %s1067_s2, 256 }
  0x26   :  { %p688_p2 = scmp.ne.s32.totalorder %s1067_s2, %s687_s18  ;;  %p691_p3 = scmp.lt.u32.totalorder %s687_s18, %s1067_s2 }
  0x28   :  { %p693_p4 = pnand %p691_p3, %p688_p2 }
  0x2a   :  { %696 = shalt.err (!%p693_p4)
}
  0x2b   :  { %s697_s23 = scalar_lea.vmem %s42_s6, 256  ;;  %p702_p6 = scmp.lt.s32.totalorder %s42_s6, %s42_s6 }
  0x2c   :  { %p698_p5 = scmp.ne.s32.totalorder %s42_s6, %s697_s23  ;;  %p703_p7 = scmp.lt.s32.totalorder %s697_s23, %s697_s23 }
  0x2e   :  { %p704_p8 = por %p703_p7, %p702_p6 }
  0x30   :  { %p705_p9 = pnand %p704_p8, %p698_p5 }
  0x32   :  { %708 = shalt.err (!%p705_p9)
}
  0x33   :  { %44 = dma.hbm_to_vmem [thread:$0]  %s1067_s2, 256, %s42_s6, [#allocation7]  }
  0x34   :  { %s766_s25 = smov [#allocation9]   ;;  %s709_s29 = scalar_lea.hbm %s1068_s3, 512 }
  0x35   :  { %s50_s26 = sshll.u32 %s766_s25, 4  ;;  %p710_p10 = scmp.ne.s32.totalorder %s1068_s3, %s709_s29  ;;  %s51_s26 = int_to_ptr.vmem [resolvable:$true] %s50_s26 }
  0x36   :  { %p713_p11 = scmp.lt.u32.totalorder %s709_s29, %s1068_s3 }
  0x38   :  { %p715_p12 = pnand %p713_p11, %p710_p10 }
  0x3a   :  { %718 = shalt.err (!%p715_p12)
}
  0x3b   :  { %s719_s9 = scalar_lea.vmem %s51_s26, 512  ;;  %p724_p0 = scmp.lt.s32.totalorder %s51_s26, %s51_s26 }
  0x3c   :  { %p720_p13 = scmp.ne.s32.totalorder %s51_s26, %s719_s9  ;;  %p725_p1 = scmp.lt.s32.totalorder %s719_s9, %s719_s9 }
  0x3e   :  { %p726_p2 = por %p725_p1, %p724_p0 }
  0x40   :  { %p727_p3 = pnand %p726_p2, %p720_p13 }
  0x42   :  { %730 = shalt.err (!%p727_p3)
}
  0x43   :  { %s767_s2 = smov 256   ;;  %s768_s6 = smov 16  }
  0x44   :  { %56 = dma.hbm_to_vmem [thread:$0]  %s1068_s3, 512, %s51_s26, [#allocation10], %s767_s2, %s767_s2, %s768_s6  }
  0x45   :  { %753 = dma.done.wait [#allocation4], 256  }
  0x46   :  { %754 = vsyncadd [#allocation4], 4294967040 }
  0x47   :  { %755 = dma.done.wait [#allocation7], 512  }
  0x48   :  { %756 = vsyncadd [#allocation7], 4294966784 }
  0x49   :  { %757 = dma.done.wait [#allocation10], 512  }
  0x4a   :  { %758 = vsyncadd [#allocation10], 4294966784  ;;  %v769_v0 = vmov 1.0   ;;  %v770_v1 = vmov 0.0   ;;  %vm84_vm0 = vcmask 1040384   ;;  %v854_v2 = vld [vmem:[#allocation3 + $0x8] sm:$0xff]  ;;  %v189_v24 = vlaneseq }
  0x4b   :  { %73 = vst [vmem:[#allocation2 + $0x130] sm:$0x1] %v769_v0  ;;  %74 = vst [vmem:[#allocation2 + $0x138] sm:$0x1] %v769_v0  ;;  %152 = vmatprep.mubr.f32.mxu0 %v770_v1  ;;  %vm771_vm1 = vmmov 1   ;;  %v860_v4 = vld [vmem:[#allocation3] sm:$0xff]  ;;  %v576_v5 = vpack.c.bf16 %v769_v0, %v854_v2 }
  0x4c   :  { %vm856_vm2 = vmpackc.low %vm84_vm0, %vm771_vm1  ;;  %v579_v6 = vpack.c.bf16 %v769_v0, %v860_v4  ;;  %v75_v7 = vld [vmem:[#allocation6] sm:$0xff]  ;;  %vm77_vm3 = vcmask 72704   ;;  %v76_v8 = vld [vmem:[#allocation6 + $0x8] sm:$0xff]  ;;  %s772_s3 = smov 17   ;;  %s773_s12 = smov 15   ;;  %vm461_vm8 = vcmask 203776  }
  0x4d   :  { %578 = vmatprep.subr.msk.bf16.mxu0 %vm856_vm2, %v576_v5  ;;  %s774_s13 = smov 1   ;;  %s775_s1 = smov 127   ;;  %v420_v23 = vld [vmem:[#allocation8 + $0x8] sm:$0xff]  ;;  %v920_v25 = vshrl.u32 %v189_v24, 7  ;;  %v922_v26 = vand.u32 127, %v189_v24  ;;  %v925_v28 = vld [vmem:[#allocation9] sm:$0xff] }
  0x4e   :  { %581 = vmatpush1.bf16.msk.msra.mxu0 %vm856_vm2, %v579_v6  ;;  %s776_s14 = smov 113   ;;  %s777_s15 = smov 112   ;;  %575 = vmatprep.mubr.msk.f32.mxu1 %vm461_vm8, %v420_v23  ;;  %v927_v29 = vld [vmem:[#allocation9 + $0x8] sm:$0xff] }
  0x4f   :  { %s778_s16 = smov 111   ;;  %v198_v27 = vsub.s32 0, %v920_v25  ;;  %vm191_vm9 = vcmp.lt.s32.totalorder %v922_v26, 17  ;;  %v227_v42 = vsub.s32 1, %v920_v25  ;;  %v256_v45 = vsub.s32 2, %v920_v25  ;;  %s779_s17 = smov [#allocation11]  }
  0x50   :  { %vm220_vm10 = vcmp.lt.s32.totalorder %v922_v26, 16  ;;  %vm249_vm11 = vcmp.lt.s32.totalorder %v922_v26, 15  ;;  %v285_v56 = vsub.s32 3, %v920_v25  ;;  %vm278_vm12 = vcmp.lt.s32.totalorder %v922_v26, 1  ;;  %s556_s18 = sshll.u32 %s779_s17, 4  ;;  %s557_s18 = int_to_ptr.vmem [resolvable:$true] %s556_s18 }
  0x51   :  { %569 = vmatmul.mubr.msk.f32.vlgmr.msra.gmra.mrb[0].mxu0 %vm77_vm3, %v75_v7  ;;  %v199_v30 = vrot.slane %v925_v28, %v198_v27  ;;  %v203_v31 = vrot.slane %v927_v29, %v198_v27  ;;  %v228_v46 = vrot.slane %v925_v28, %v227_v42  ;;  %v232_v47 = vrot.slane %v927_v29, %v227_v42  ;;  %s731_s19 = scalar_lea.vmem %s557_s18, 256  ;;  %p736_p5 = scmp.lt.s32.totalorder %s557_s18, %s557_s18 }
  0x52   :  { %158 = vmatprep.mubr.f32.mxu0 %v770_v1  ;;  %v257_v52 = vrot.slane %v925_v28, %v256_v45  ;;  %v261_v55 = vrot.slane %v927_v29, %v256_v45  ;;  %v286_v63 = vrot.slane %v925_v28, %v285_v56  ;;  %v290_v0 = vrot.slane %v927_v29, %v285_v56  ;;  %p732_p4 = scmp.ne.s32.totalorder %s557_s18, %s731_s19  ;;  %p737_p6 = scmp.lt.s32.totalorder %s731_s19, %s731_s19 }
  0x53   :  { %vm311_vm13 = vcmp.lt.s32.totalorder %v922_v26, 127  ;;  %vm340_vm14 = vcmp.lt.s32.totalorder %v922_v26, 113  ;;  %vm369_vm15 = vcmp.lt.s32.totalorder %v922_v26, 112  ;;  %vm398_vm0 = vcmp.lt.s32.totalorder %v922_v26, 111  ;;  %v419_v26 = vld [vmem:[#allocation8] sm:$0xff] }
  0x54   :  { %p738_p7 = por %p737_p6, %p736_p5 }
  0x55   :  { %570 = vmatmul.mubr.msk.f32.gmra.mrb[2].mxu0 %vm77_vm3, %v76_v8 }
  0x56   :  { %p739_p8 = pnand %p738_p7, %p732_p4 }
 0x124   :  { %v154_v9 = vpop.f32.mrb[0].mxu0 }
 0x125   :  { %vm165_vm4 = vcmp.gt.f32.partialorder %v154_v9, 0.0  ;;  %v169_v10 = vmul.f32 0.333, %v154_v9  ;;  %v156_v11 = vpop.f32.mrb[1].mxu0 }
 0x126   :  { %vm166_vm5 = vcmp.gt.f32.partialorder %v156_v11, 0.0  ;;  %v170_v12 = vmul.f32 0.333, %v156_v11 }
 0x127   :  { %v868_v13 = vsel %vm165_vm4, %v154_v9, %v169_v10 }
 0x128   :  { %v870_v14 = vsel %vm166_vm5, %v156_v11, %v170_v12  ;;  %181 = vrot.lane.b32.xlu0 %v868_v13, %s772_s3  ;;  %v160_v15 = vpop.f32.mrb[2].mxu0 }
 0x129   :  { %vm167_vm6 = vcmp.gt.f32.partialorder %v160_v15, 0.0  ;;  %v171_v16 = vmul.f32 0.333, %v160_v15  ;;  %185 = vrot.lane.b32.xlu1 %v870_v14, %s772_s3  ;;  %v162_v17 = vpop.f32.mrb[3].mxu0 }
 0x12a   :  { %vm168_vm7 = vcmp.gt.f32.partialorder %v162_v17, 0.0  ;;  %v172_v18 = vmul.f32 0.333, %v162_v17 }
 0x12b   :  { %v876_v19 = vsel %vm167_vm6, %v160_v15, %v171_v16  ;;  %v318_v16 = vsub.s32 5, %v920_v25 }
 0x12c   :  { %v878_v20 = vsel %vm168_vm7, %v162_v17, %v172_v18  ;;  %212 = vrot.lane.b32.xlu0 %v868_v13, %s768_s6  ;;  %v600_v21 = vpack.c.bf16 %v876_v19, %v868_v13 }
 0x12d   :  { %214 = vrot.lane.b32.xlu1 %v876_v19, %s768_s6  ;;  %v598_v22 = vpack.c.bf16 %v878_v20, %v870_v14 }
 0x130   :  { %241 = vrot.lane.b32.xlu0 %v868_v13, %s773_s12 }
 0x131   :  { %243 = vrot.lane.b32.xlu1 %v876_v19, %s773_s12 }
 0x134   :  { %270 = vrot.lane.b32.xlu0 %v868_v13, %s774_s13 }
 0x135   :  { %272 = vrot.lane.b32.xlu1 %v876_v19, %s774_s13 }
 0x138   :  { %216 = vrot.lane.b32.xlu0 %v870_v14, %s768_s6 }
 0x139   :  { %305 = vrot.lane.b32.xlu1 %v876_v19, %s775_s1 }
 0x13c   :  { %245 = vrot.lane.b32.xlu0 %v870_v14, %s773_s12 }
 0x13d   :  { %334 = vrot.lane.b32.xlu1 %v876_v19, %s776_s14 }
 0x140   :  { %274 = vrot.lane.b32.xlu0 %v870_v14, %s774_s13 }
 0x141   :  { %363 = vrot.lane.b32.xlu1 %v876_v19, %s777_s15 }
 0x144   :  { %183 = vrot.lane.b32.xlu0 %v876_v19, %s772_s3 }
 0x145   :  { %187 = vrot.lane.b32.xlu1 %v878_v20, %s772_s3 }
 0x148   :  { %303 = vrot.lane.b32.xlu0 %v868_v13, %s775_s1 }
 0x149   :  { %218 = vrot.lane.b32.xlu1 %v878_v20, %s768_s6 }
 0x14c   :  { %307 = vrot.lane.b32.xlu0 %v870_v14, %s775_s1 }
 0x14d   :  { %247 = vrot.lane.b32.xlu1 %v878_v20, %s773_s12 }
 0x150   :  { %332 = vrot.lane.b32.xlu0 %v868_v13, %s776_s14 }
 0x151   :  { %276 = vrot.lane.b32.xlu1 %v878_v20, %s774_s13 }
 0x154   :  { %336 = vrot.lane.b32.xlu0 %v870_v14, %s776_s14 }
 0x155   :  { %392 = vrot.lane.b32.xlu1 %v876_v19, %s778_s16 }
 0x158   :  { %361 = vrot.lane.b32.xlu0 %v868_v13, %s777_s15 }
 0x159   :  { %309 = vrot.lane.b32.xlu1 %v878_v20, %s775_s1 }
 0x15c   :  { %365 = vrot.lane.b32.xlu0 %v870_v14, %s777_s15 }
 0x15d   :  { %338 = vrot.lane.b32.xlu1 %v878_v20, %s776_s14 }
 0x160   :  { %390 = vrot.lane.b32.xlu0 %v868_v13, %s778_s16 }
 0x161   :  { %367 = vrot.lane.b32.xlu1 %v878_v20, %s777_s15 }
 0x164   :  { %394 = vrot.lane.b32.xlu0 %v870_v14, %s778_s16 }
 0x165   :  { %396 = vrot.lane.b32.xlu1 %v878_v20, %s778_s16 }
 0x19a   :  { %v182_v32 = vpop.permute.xlu0 %181 }
 0x19b   :  { %v186_v33 = vpop.permute.xlu1 %185 }
 0x19c   :  { %v192_v34 = vsel %vm191_vm9, %v182_v32, %v186_v33  ;;  %v194_v35 = vsel %vm191_vm9, %v186_v33, %v182_v32 }
 0x19d   :  { %v204_v36 = vmul.f32 %v199_v30, %v194_v35  ;;  %v205_v37 = vmul.f32 %v203_v31, %v192_v34  ;;  %v319_v35 = vrot.slane %v925_v28, %v318_v16 }
 0x19e   :  { %v213_v38 = vpop.permute.xlu0 %212 }
 0x19f   :  { %v215_v39 = vpop.permute.xlu1 %214 }
 0x1a2   :  { %v242_v40 = vpop.permute.xlu0 %241 }
 0x1a3   :  { %v936_v41 = vpop.permute.xlu1 %243 }
 0x1a6   :  { %v271_v43 = vpop.permute.xlu0 %270 }
 0x1a7   :  { %v939_v44 = vpop.permute.xlu1 %272 }
 0x1aa   :  { %v217_v48 = vpop.permute.xlu0 %216 }
 0x1ab   :  { %v221_v49 = vsel %vm220_vm10, %v213_v38, %v217_v48  ;;  %v223_v50 = vsel %vm220_vm10, %v217_v48, %v213_v38  ;;  %v949_v51 = vpop.permute.xlu1 %305  ;;  %v323_v38 = vrot.slane %v927_v29, %v318_v16  ;;  %v376_v16 = vsub.s32 7, %v920_v25 }
 0x1ac   :  { %v233_v53 = vmul.f32 %v228_v46, %v223_v50  ;;  %v234_v54 = vmul.f32 %v232_v47, %v221_v49 }
 0x1ae   :  { %v246_v57 = vpop.permute.xlu0 %245 }
 0x1af   :  { %v250_v58 = vsel %vm249_vm11, %v242_v40, %v246_v57  ;;  %v252_v59 = vsel %vm249_vm11, %v246_v57, %v242_v40  ;;  %v959_v60 = vpop.permute.xlu1 %334 }
 0x1b0   :  { %v262_v61 = vmul.f32 %v257_v52, %v252_v59  ;;  %v263_v62 = vmul.f32 %v261_v55, %v250_v58 }
 0x1b2   :  { %v275_v1 = vpop.permute.xlu0 %274 }
 0x1b3   :  { %v279_v5 = vsel %vm278_vm12, %v271_v43, %v275_v1  ;;  %v281_v6 = vsel %vm278_vm12, %v275_v1, %v271_v43  ;;  %v968_v7 = vpop.permute.xlu1 %363 }
 0x1b4   :  { %v291_v8 = vmul.f32 %v286_v63, %v281_v6  ;;  %v292_v9 = vmul.f32 %v290_v0, %v279_v5 }
 0x1b6   :  { %v184_v10 = vpop.permute.xlu0 %183 }
 0x1b7   :  { %v188_v11 = vpop.permute.xlu1 %187 }
 0x1b8   :  { %v193_v12 = vsel %vm191_vm9, %v184_v10, %v188_v11  ;;  %v195_v15 = vsel %vm191_vm9, %v188_v11, %v184_v10 }
 0x1b9   :  { %v206_v17 = vmul.f32 %v199_v30, %v195_v15  ;;  %v207_v18 = vmul.f32 %v203_v31, %v193_v12  ;;  %v347_v31 = vsub.s32 6, %v920_v25  ;;  %v377_v25 = vrot.slane %v925_v28, %v376_v16 }
 0x1ba   :  { %v304_v23 = vpop.permute.xlu0 %303 }
 0x1bb   :  { %v219_v24 = vpop.permute.xlu1 %218  ;;  %v582_v27 = vpack.c.bf16 %v207_v18, %v205_v37  ;;  %v584_v32 = vpack.c.bf16 %v206_v17, %v204_v36 }
 0x1bc   :  { %v222_v33 = vsel %vm220_vm10, %v215_v39, %v219_v24  ;;  %v224_v34 = vsel %vm220_vm10, %v219_v24, %v215_v39 }
 0x1bd   :  { %v235_v40 = vmul.f32 %v228_v46, %v224_v34  ;;  %v236_v42 = vmul.f32 %v232_v47, %v222_v33  ;;  %583 = vmatprep.subr.bf16.mxu1 %v582_v27 }
 0x1be   :  { %v308_v30 = vpop.permute.xlu0 %307  ;;  %585 = vmatpush1.bf16.msra.mxu1 %v584_v32 }
 0x1bf   :  { %v312_v36 = vsel %vm311_vm13, %v304_v23, %v308_v30  ;;  %v314_v37 = vsel %vm311_vm13, %v308_v30, %v304_v23  ;;  %v248_v43 = vpop.permute.xlu1 %247  ;;  %v586_v45 = vpack.c.bf16 %v236_v42, %v234_v54  ;;  %v588_v39 = vpack.c.bf16 %v235_v40, %v233_v53 }
 0x1c0   :  { %v324_v48 = vmul.f32 %v319_v35, %v312_v36  ;;  %v325_v49 = vmul.f32 %v323_v38, %v314_v37  ;;  %v251_v46 = vsel %vm249_vm11, %v936_v41, %v248_v43  ;;  %v253_v47 = vsel %vm249_vm11, %v248_v43, %v936_v41  ;;  %v572_v36 = vld [vmem:[#allocation9 + $0x18] ss:$0 sm:$0xff] }
 0x1c1   :  { %v264_v50 = vmul.f32 %v257_v52, %v253_v47  ;;  %v265_v56 = vmul.f32 %v261_v55, %v251_v46  ;;  %587 = vmatprep.subr.bf16.mxu1 %v586_v45  ;;  %v348_v41 = vrot.slane %v925_v28, %v347_v31  ;;  %v352_v52 = vrot.slane %v927_v29, %v347_v31  ;;  %v571_v31 = vld [vmem:[#allocation9 + $0x10] ss:$0 sm:$0xff] }
 0x1c2   :  { %v333_v57 = vpop.permute.xlu0 %332  ;;  %589 = vmatpush1.bf16.msra.mxu1 %v588_v39 }
 0x1c3   :  { %v277_v58 = vpop.permute.xlu1 %276  ;;  %v590_v54 = vpack.c.bf16 %v265_v56, %v263_v62  ;;  %v592_v53 = vpack.c.bf16 %v264_v50, %v262_v61  ;;  %v460_v56 = vld [vmem:[#allocation2 + $0x138] sm:$0x1] }
 0x1c4   :  { %v280_v59 = vsel %vm278_vm12, %v939_v44, %v277_v58  ;;  %v282_v1 = vsel %vm278_vm12, %v277_v58, %v939_v44 }
 0x1c5   :  { %v293_v55 = vmul.f32 %v286_v63, %v282_v1  ;;  %v294_v5 = vmul.f32 %v290_v0, %v280_v59  ;;  %591 = vmatprep.subr.bf16.mxu1 %v590_v54  ;;  %v618_v59 = vpack.c.bf16 %v460_v56, %v854_v2  ;;  %v459_v1 = vld [vmem:[#allocation2 + $0x130] sm:$0x1] }
 0x1c6   :  { %v337_v6 = vpop.permute.xlu0 %336  ;;  %593 = vmatpush1.bf16.msra.mxu1 %v592_v53 }
 0x1c7   :  { %v341_v61 = vsel %vm340_vm14, %v333_v57, %v337_v6  ;;  %v343_v62 = vsel %vm340_vm14, %v337_v6, %v333_v57  ;;  %v393_v10 = vpop.permute.xlu1 %392  ;;  %v594_v11 = vpack.c.bf16 %v294_v5, %v292_v9  ;;  %v596_v12 = vpack.c.bf16 %v293_v55, %v291_v8 }
 0x1c8   :  { %v353_v15 = vmul.f32 %v348_v41, %v341_v61  ;;  %v354_v44 = vmul.f32 %v352_v52, %v343_v62  ;;  %v381_v9 = vrot.slane %v927_v29, %v376_v16 }
 0x1c9   :  { %595 = vmatprep.subr.bf16.mxu1 %v594_v11 }
 0x1ca   :  { %v362_v17 = vpop.permute.xlu0 %361  ;;  %597 = vmatpush1.bf16.msra.mxu1 %v596_v12 }
 0x1cb   :  { %v310_v63 = vpop.permute.xlu1 %309  ;;  %599 = vmatprep.subr.bf16.mxu1 %v598_v22 }
 0x1cc   :  { %v313_v0 = vsel %vm311_vm13, %v949_v51, %v310_v63  ;;  %v315_v8 = vsel %vm311_vm13, %v310_v63, %v949_v51 }
 0x1cd   :  { %v326_v18 = vmul.f32 %v319_v35, %v313_v0  ;;  %v327_v23 = vmul.f32 %v323_v38, %v315_v8 }
 0x1ce   :  { %v366_v24 = vpop.permute.xlu0 %365  ;;  %601 = vmatpush1.bf16.msra.mxu1 %v600_v21 }
 0x1cf   :  { %v370_v14 = vsel %vm369_vm15, %v362_v17, %v366_v24  ;;  %v372_v20 = vsel %vm369_vm15, %v366_v24, %v362_v17  ;;  %v339_v22 = vpop.permute.xlu1 %338  ;;  %v602_v27 = vpack.c.bf16 %v327_v23, %v325_v49  ;;  %v604_v51 = vpack.c.bf16 %v326_v18, %v324_v48 }
 0x1d0   :  { %v382_v32 = vmul.f32 %v377_v25, %v370_v14  ;;  %v383_v28 = vmul.f32 %v381_v9, %v372_v20  ;;  %v342_v29 = vsel %vm340_vm14, %v959_v60, %v339_v22  ;;  %v344_v13 = vsel %vm340_vm14, %v339_v22, %v959_v60 }
 0x1d1   :  { %v355_v19 = vmul.f32 %v348_v41, %v342_v29  ;;  %v356_v21 = vmul.f32 %v352_v52, %v344_v13  ;;  %603 = vmatprep.subr.bf16.mxu1 %v602_v27  ;;  %v621_v41 = vpack.c.bf16 %v459_v1, %v860_v4 }
 0x1d2   :  { %v391_v33 = vpop.permute.xlu0 %390  ;;  %605 = vmatpush1.bf16.msra.mxu1 %v604_v51 }
 0x1d3   :  { %v368_v34 = vpop.permute.xlu1 %367  ;;  %v606_v35 = vpack.c.bf16 %v356_v21, %v354_v44  ;;  %v608_v38 = vpack.c.bf16 %v355_v19, %v353_v15 }
 0x1d4   :  { %v371_v40 = vsel %vm369_vm15, %v968_v7, %v368_v34  ;;  %v373_v42 = vsel %vm369_vm15, %v368_v34, %v968_v7 }
 0x1d5   :  { %v384_v30 = vmul.f32 %v377_v25, %v371_v40  ;;  %v385_v60 = vmul.f32 %v381_v9, %v373_v42  ;;  %607 = vmatprep.subr.bf16.mxu1 %v606_v35 }
 0x1d6   :  { %v395_v37 = vpop.permute.xlu0 %394  ;;  %609 = vmatpush1.bf16.msra.mxu1 %v608_v38 }
 0x1d7   :  { %v399_v43 = vsel %vm398_vm0, %v391_v33, %v395_v37  ;;  %v401_v45 = vsel %vm398_vm0, %v395_v37, %v391_v33  ;;  %v397_v39 = vpop.permute.xlu1 %396  ;;  %v610_v48 = vpack.c.bf16 %v385_v60, %v383_v28  ;;  %v612_v49 = vpack.c.bf16 %v384_v30, %v382_v32 }
 0x1d8   :  { %v411_v46 = vmul.f32 %v571_v31, %v399_v43  ;;  %v412_v7 = vmul.f32 %v572_v36, %v401_v45  ;;  %v400_v47 = vsel %vm398_vm0, %v393_v10, %v397_v39  ;;  %v402_v50 = vsel %vm398_vm0, %v397_v39, %v393_v10 }
 0x1d9   :  { %v413_v57 = vmul.f32 %v571_v31, %v400_v47  ;;  %v414_v58 = vmul.f32 %v572_v36, %v402_v50  ;;  %611 = vmatprep.subr.bf16.mxu1 %v610_v48 }
 0x1da   :  { %613 = vmatpush1.bf16.msra.mxu1 %v612_v49 }
 0x1db   :  { %v614_v54 = vpack.c.bf16 %v414_v58, %v412_v7  ;;  %v616_v53 = vpack.c.bf16 %v413_v57, %v411_v46 }
 0x1dd   :  { %615 = vmatprep.subr.bf16.mxu1 %v614_v54 }
 0x1de   :  { %617 = vmatpush1.bf16.msra.mxu1 %v616_v53 }
 0x1df   :  { %620 = vmatprep.subr.msk.bf16.mxu1 %vm856_vm2, %v618_v59 }
 0x1e2   :  { %623 = vmatpush1.bf16.msk.msra.mxu1 %vm856_vm2, %v621_v41 }
 0x1e5   :  { %536 = vmatmul.mubr.f32.vlgmr.msra.gmra.mrb[0].mxu1 %v419_v26 }
 0x2b8   :  { %v537_v52 = vpop.f32.mrb[0].mxu1 }
 0x2b9   :  { %vm542_vm1 = vcmp.gt.f32.partialorder %v537_v52, 0.0  ;;  %v544_v55 = vmul.f32 0.333, %v537_v52  ;;  %v539_v5 = vpop.f32.mrb[1].mxu1 }
 0x2ba   :  { %vm543_vm3 = vcmp.gt.f32.partialorder %v539_v5, 0.0  ;;  %v545_v2 = vmul.f32 0.333, %v539_v5 }
 0x2bb   :  { %v546_v6 = vsel %vm542_vm1, %v537_v52, %v544_v55 }
 0x2bc   :  { %548 = vst [vmem:[#allocation11] sm:$0xff] %v546_v6  ;;  %v547_v4 = vsel %vm543_vm3, %v539_v5, %v545_v2 }
 0x2bd   :  { %549 = vst [vmem:[#allocation11 + $0x8] sm:$0xff] %v547_v4 }
 0x2be   :  { %742 = shalt.err (!%p739_p8)
}
 0x2bf   :  { %s743_s22 = scalar_lea.hbm %s1069_s4, 256 }
 0x2c0   :  { %p744_p9 = scmp.ne.s32.totalorder %s1069_s4, %s743_s22  ;;  %p747_p10 = scmp.lt.u32.totalorder %s743_s22, %s1069_s4 }
 0x2c2   :  { %p749_p11 = pnand %p747_p10, %p744_p9 }
 0x2c4   :  { %752 = shalt.err (!%p749_p11)
}
 0x2c5   :  { %559 = dma.vmem_to_hbm [thread:$0]  %s557_s18, 256, %s1069_s4, [#allocation5]  }
 0x2c6   :  { %759 = dma.done.wait [#allocation5], 256  }
 0x2c7   :  { %760 = vsyncadd [#allocation5], 4294967040 }
 0x2c8   :  { %563 = vsyncpa [#allocation4], 1 }
 0x2c9   :  { %564 = vsyncpa [#allocation7], 1 }
 0x2ca   :  { %565 = vsyncpa [#allocation10], 1 }
 0x2cb   :  { %566 = vsyncpa [#allocation5], 1 }

</bundles_post_ra>
